<compile_context>
chip_gen: v7x
topology: tpu7x:2x2x1
jax: 0.10.0
libtpu: 0.0.40
codegen_flags: <defaults>
</compile_context>

<pallas_src>
import functools

import jax
import jax.numpy as jnp
from jax.experimental import pallas as pl
from jax.experimental.pallas import tpu as pltpu

_LANE = 128
_SUBLANE = 8
_NEG_SLOPE = 0.01  # PyTorch nn.LeakyReLU default


def _round_up(n, m):
    return ((n + m - 1) // m) * m


# --------------------------------------------------------------------------
# Kernel body: the entire MLP, activations stay on-chip between layers.
# refs = (w0, b0, w1, b1, ..., w_{L-1}, b_{L-1}, o_ref)
#   x_ref : (tb, d_in)            f32   (logical input width, no lane pad)
#   w_i   : (Din_i, Dout_i)       compute dtype (hidden dims padded to 128)
#   b_i   : (1, Dout_i)           f32
#   o_ref : (tb, d_out)           f32   (logical output width, no lane pad)
# --------------------------------------------------------------------------
def _fused_mlp_kernel(x_ref, *refs, n_layers):
    o_ref = refs[-1]
    h = x_ref[...]
    for i in range(n_layers):
        w = refs[2 * i][...]
        b = refs[2 * i + 1][...]
        # Cast activations to the weight dtype (no-op for f32); accumulate f32.
        h = jnp.dot(h.astype(w.dtype), w, preferred_element_type=jnp.float32) + b
        if i < n_layers - 1:
            # LeakyReLU, negative_slope = 0.01 (f32 on the VPU).
            h = jnp.where(h > 0, h, jnp.float32(_NEG_SLOPE) * h)
    o_ref[...] = h.astype(o_ref.dtype)


# --------------------------------------------------------------------------
# One-time parameter preparation (hoisted out of the forward path).
# Pads only the HIDDEN feature dims to multiples of 128 lanes; the network
# input width and output width stay logical.  Zero padding is benign through
# LeakyReLU (0 -> 0) and contributes nothing to downstream dots, so results
# are identical to the unpadded math.
# --------------------------------------------------------------------------
def prepare_nnl_params(params, compute_dtype=jnp.float32):
    n = len(params)
    prepped = []
    d_prev_p = params[0][0].shape[0]  # logical (unpadded) input width
    for i, (w_t, b) in enumerate(params):
        d_in, d_out = w_t.shape
        d_in_p = d_prev_p
        d_out_p = d_out if i == n - 1 else _round_up(d_out, _LANE)
        w_p = jnp.zeros((d_in_p, d_out_p), compute_dtype)
        w_p = w_p.at[:d_in, :d_out].set(w_t.astype(compute_dtype))
        b_p = jnp.zeros((1, d_out_p), jnp.float32).at[0, :d_out].set(
            b.astype(jnp.float32))
        prepped.append((w_p, b_p))
        d_prev_p = d_out_p
    return prepped


def _choose_batch_tiling(B, batch_tile):
    """Pick (tile_rows, padded_batch) minimizing zero-row padding.

    - Tiles are multiples of 8 sublanes and never larger than batch_tile.
    - When the batch exceeds one tile, rows are split evenly across steps so
      at most a few padding rows are added (no near-full extra tile).
    - Once there is enough work, force >= 2 grid steps so v7x's second
      TensorCore is used (grid axis is marked "parallel").
    """
    rb = _round_up(B, _SUBLANE)
    n_steps = pl.cdiv(rb, batch_tile)
    if n_steps == 1 and rb >= 8 * _SUBLANE:
        n_steps = 2
    tb = _round_up(pl.cdiv(rb, n_steps), _SUBLANE)
    return tb, tb * n_steps


# --------------------------------------------------------------------------
# Forward: single pallas_call; only x / out tiles are pipelined over the
# (parallel) batch grid, weights/biases stay VMEM-resident.
# --------------------------------------------------------------------------
def nnl_forward(prepped_params, in_feat, *, batch_tile=1024):
    B, d_in = in_feat.shape
    n_layers = len(prepped_params)
    assert prepped_params[0][0].shape[0] == d_in, "input width mismatch"
    d_out = prepped_params[-1][0].shape[1]

    tb, b_p = _choose_batch_tiling(B, batch_tile)

    x = in_feat.astype(jnp.float32)
    if b_p != B:
        # Row padding only (no lane padding); skipped entirely when B % tb == 0.
        x = jnp.pad(x, ((0, b_p - B), (0, 0)))

    in_specs = [pl.BlockSpec((tb, d_in), lambda i: (i, 0))]
    flat_args = [x]
    for w_pad, bias_pad in prepped_params:
        dwi, dwo = w_pad.shape
        # Same (0, 0) block every grid step -> loaded once, VMEM-resident.
        in_specs.append(pl.BlockSpec((dwi, dwo), lambda i: (0, 0)))
        in_specs.append(pl.BlockSpec((1, dwo), lambda i: (0, 0)))
        flat_args.extend([w_pad, bias_pad])

    kernel = functools.partial(_fused_mlp_kernel, n_layers=n_layers)
    out = pl.pallas_call(
        kernel,
        out_shape=jax.ShapeDtypeStruct((b_p, d_out), jnp.float32),
        grid=(b_p // tb,),
        in_specs=in_specs,
        out_specs=pl.BlockSpec((tb, d_out), lambda i: (i, 0)),
        compiler_params=pltpu.CompilerParams(
            dimension_semantics=("parallel",)),
    )(*flat_args)

    return out if b_p == B else out[:B]


# --------------------------------------------------------------------------
# Test scaffolding
# --------------------------------------------------------------------------
def init_nnl_params(key, h_feat_dims, n_out_feats):
    """Deterministic synthetic parameters matching nn.Linear shapes.

    Returns a list of (W_transposed (D_in, D_out), b (D_out,)) for the hidden
    layers plus the output layer (matches NNL's NN_Layers + Out).
    """
    params = []
    dims = list(h_feat_dims) + [n_out_feats]
    for i in range(len(dims) - 1):
        d_in, d_out = dims[i], dims[i + 1]
        key, kw, kb = jax.random.split(key, 3)
        bound = 1.0 / jnp.sqrt(jnp.float32(d_in))
        w = jax.random.uniform(kw, (d_out, d_in), jnp.float32, -bound, bound)
        b = jax.random.uniform(kb, (d_out,), jnp.float32, -bound, bound)
        params.append((w.T, b))
    return params


def nnl_forward_ref(params, in_feat):
    """Pure-JAX reference for correctness check."""
    h = in_feat
    for i in range(len(params) - 1):
        w_t, b = params[i]
        h = h @ w_t + b
        h = jnp.where(h > 0, h, _NEG_SLOPE * h)
    w_t, b = params[-1]
    return h @ w_t + b


if __name__ == "__main__":
    key = jax.random.PRNGKey(0)

    # Small shapes consistent with the module: MLP over feature vectors.
    h_feat_dims = [32, 64, 32]
    n_out_feats = 8
    batch = 8

    key, k_in, k_par = jax.random.split(key, 3)
    x = jax.random.normal(k_in, (batch, h_feat_dims[0]), jnp.float32)
    params = init_nnl_params(k_par, h_feat_dims, n_out_feats)

    # Pad/prepare weights ONCE (init-time), then run the fused forward.
    prepped = prepare_nnl_params(params, compute_dtype=jnp.float32)
    out = nnl_forward(prepped, x)
    out = jax.block_until_ready(out)

    ref = nnl_forward_ref(params, x)
    assert out.shape == (batch, n_out_feats)
    assert jnp.allclose(out, ref, atol=1e-4, rtol=1e-4)

    print("KERNEL_OK")
</pallas_src>

<mosaic_0001>
module attributes {stable_mosaic.version = 11 : i64} {
  func.func @_fused_mlp_kernel(%arg0: i32, %arg1: memref<8x32xf32, #tpu.memory_space<vmem>>, %arg2: memref<32x128xf32, #tpu.memory_space<vmem>>, %arg3: memref<1x128xf32, #tpu.memory_space<vmem>>, %arg4: memref<128x128xf32, #tpu.memory_space<vmem>>, %arg5: memref<1x128xf32, #tpu.memory_space<vmem>>, %arg6: memref<128x8xf32, #tpu.memory_space<vmem>>, %arg7: memref<1x8xf32, #tpu.memory_space<vmem>>, %arg8: memref<8x8xf32, #tpu.memory_space<vmem>>) attributes {dimension_semantics = [#tpu.dimension_semantics<parallel>], iteration_bounds = array<i64: 1>, scalar_prefetch = 0 : i64, scratch_operands = 0 : i64, tpu.core_type = #tpu.core_type<tc>, window_params = [{transform_indices = @transform_0, window_bounds = array<i64: 8, 32>}, {pipeline_mode = #tpu.pipeline_mode<synchronous>, transform_indices = @transform_1, window_bounds = array<i64: 32, 128>}, {pipeline_mode = #tpu.pipeline_mode<synchronous>, transform_indices = @transform_2, window_bounds = array<i64: 1, 128>}, {pipeline_mode = #tpu.pipeline_mode<synchronous>, transform_indices = @transform_3, window_bounds = array<i64: 128, 128>}, {pipeline_mode = #tpu.pipeline_mode<synchronous>, transform_indices = @transform_4, window_bounds = array<i64: 1, 128>}, {pipeline_mode = #tpu.pipeline_mode<synchronous>, transform_indices = @transform_5, window_bounds = array<i64: 128, 8>}, {pipeline_mode = #tpu.pipeline_mode<synchronous>, transform_indices = @transform_6, window_bounds = array<i64: 1, 8>}, {transform_indices = @transform_7, window_bounds = array<i64: 8, 8>}]} {
    %c0 = arith.constant 0 : index
    %c0_0 = arith.constant 0 : index
    %0 = vector.load %arg1[%c0, %c0_0] : memref<8x32xf32, #tpu.memory_space<vmem>>, vector<8x32xf32>
    %c0_1 = arith.constant 0 : index
    %c0_2 = arith.constant 0 : index
    %1 = vector.load %arg2[%c0_1, %c0_2] : memref<32x128xf32, #tpu.memory_space<vmem>>, vector<32x128xf32>
    %c0_3 = arith.constant 0 : index
    %c0_4 = arith.constant 0 : index
    %2 = vector.load %arg3[%c0_3, %c0_4] : memref<1x128xf32, #tpu.memory_space<vmem>>, vector<1x128xf32>
    %cst = arith.constant dense<0.000000e+00> : vector<8x128xf32>
    %3 = tpu.matmul %0, %1, %cst {dimension_numbers = #tpu.dot_dimension_numbers<[1], [0], [0], [1], [0, 0, 1, 1], [], []>} : vector<8x32xf32>, vector<32x128xf32>, vector<8x128xf32> -> vector<8x128xf32>
    %4 = vector.broadcast %2 : vector<1x128xf32> to vector<8x128xf32>
    %5 = arith.addf %3, %4 : vector<8x128xf32>
    %cst_5 = arith.constant 0.000000e+00 : f32
    %6 = vector.broadcast %cst_5 : f32 to vector<8x128xf32>
    %7 = arith.cmpf ogt, %5, %6 : vector<8x128xf32>
    %cst_6 = arith.constant 0.00999999977 : f32
    %8 = vector.broadcast %cst_6 : f32 to vector<8x128xf32>
    %9 = arith.mulf %8, %5 : vector<8x128xf32>
    %10 = arith.select %7, %5, %9 : vector<8x128xi1>, vector<8x128xf32>
    %c0_7 = arith.constant 0 : index
    %c0_8 = arith.constant 0 : index
    %11 = vector.load %arg4[%c0_7, %c0_8] : memref<128x128xf32, #tpu.memory_space<vmem>>, vector<128x128xf32>
    %c0_9 = arith.constant 0 : index
    %c0_10 = arith.constant 0 : index
    %12 = vector.load %arg5[%c0_9, %c0_10] : memref<1x128xf32, #tpu.memory_space<vmem>>, vector<1x128xf32>
    %cst_11 = arith.constant dense<0.000000e+00> : vector<8x128xf32>
    %13 = tpu.matmul %10, %11, %cst_11 {dimension_numbers = #tpu.dot_dimension_numbers<[1], [0], [0], [1], [0, 0, 1, 1], [], []>} : vector<8x128xf32>, vector<128x128xf32>, vector<8x128xf32> -> vector<8x128xf32>
    %14 = vector.broadcast %12 : vector<1x128xf32> to vector<8x128xf32>
    %15 = arith.addf %13, %14 : vector<8x128xf32>
    %cst_12 = arith.constant 0.000000e+00 : f32
    %16 = vector.broadcast %cst_12 : f32 to vector<8x128xf32>
    %17 = arith.cmpf ogt, %15, %16 : vector<8x128xf32>
    %cst_13 = arith.constant 0.00999999977 : f32
    %18 = vector.broadcast %cst_13 : f32 to vector<8x128xf32>
    %19 = arith.mulf %18, %15 : vector<8x128xf32>
    %20 = arith.select %17, %15, %19 : vector<8x128xi1>, vector<8x128xf32>
    %c0_14 = arith.constant 0 : index
    %c0_15 = arith.constant 0 : index
    %21 = vector.load %arg6[%c0_14, %c0_15] : memref<128x8xf32, #tpu.memory_space<vmem>>, vector<128x8xf32>
    %c0_16 = arith.constant 0 : index
    %c0_17 = arith.constant 0 : index
    %22 = vector.load %arg7[%c0_16, %c0_17] : memref<1x8xf32, #tpu.memory_space<vmem>>, vector<1x8xf32>
    %cst_18 = arith.constant dense<0.000000e+00> : vector<8x8xf32>
    %23 = tpu.matmul %20, %21, %cst_18 {dimension_numbers = #tpu.dot_dimension_numbers<[1], [0], [0], [1], [0, 0, 1, 1], [], []>} : vector<8x128xf32>, vector<128x8xf32>, vector<8x8xf32> -> vector<8x8xf32>
    %24 = vector.broadcast %22 : vector<1x8xf32> to vector<8x8xf32>
    %25 = arith.addf %23, %24 : vector<8x8xf32>
    %c0_19 = arith.constant 0 : index
    %c0_20 = arith.constant 0 : index
    %26 = vector.load %arg8[%c0_19, %c0_20] : memref<8x8xf32, #tpu.memory_space<vmem>>, vector<8x8xf32>
    tpu.vector_store %arg8[%c0_19, %c0_20], %25 {strides = array<i32>} : memref<8x8xf32, #tpu.memory_space<vmem>>, vector<8x8xf32>,
    return
  }
  func.func @transform_0(%arg0: i32) -> (i32, i32) {
    %c0_i32 = arith.constant 0 : i32
    %c0_i32_0 = arith.constant 0 : i32
    return %arg0, %c0_i32 : i32, i32
  }
  func.func @transform_1(%arg0: i32) -> (i32, i32) {
    %c0_i32 = arith.constant 0 : i32
    %c0_i32_0 = arith.constant 0 : i32
    %c0_i32_1 = arith.constant 0 : i32
    return %c0_i32, %c0_i32_0 : i32, i32
  }
  func.func @transform_2(%arg0: i32) -> (i32, i32) {
    %c0_i32 = arith.constant 0 : i32
    %c0_i32_0 = arith.constant 0 : i32
    %c0_i32_1 = arith.constant 0 : i32
    return %c0_i32, %c0_i32_0 : i32, i32
  }
  func.func @transform_3(%arg0: i32) -> (i32, i32) {
    %c0_i32 = arith.constant 0 : i32
    %c0_i32_0 = arith.constant 0 : i32
    %c0_i32_1 = arith.constant 0 : i32
    return %c0_i32, %c0_i32_0 : i32, i32
  }
  func.func @transform_4(%arg0: i32) -> (i32, i32) {
    %c0_i32 = arith.constant 0 : i32
    %c0_i32_0 = arith.constant 0 : i32
    %c0_i32_1 = arith.constant 0 : i32
    return %c0_i32, %c0_i32_0 : i32, i32
  }
  func.func @transform_5(%arg0: i32) -> (i32, i32) {
    %c0_i32 = arith.constant 0 : i32
    %c0_i32_0 = arith.constant 0 : i32
    %c0_i32_1 = arith.constant 0 : i32
    return %c0_i32, %c0_i32_0 : i32, i32
  }
  func.func @transform_6(%arg0: i32) -> (i32, i32) {
    %c0_i32 = arith.constant 0 : i32
    %c0_i32_0 = arith.constant 0 : i32
    %c0_i32_1 = arith.constant 0 : i32
    return %c0_i32, %c0_i32_0 : i32, i32
  }
  func.func @transform_7(%arg0: i32) -> (i32, i32) {
    %c0_i32 = arith.constant 0 : i32
    %c0_i32_0 = arith.constant 0 : i32
    return %arg0, %c0_i32 : i32, i32
  }
}

</mosaic_0001>

<bundles_post_ra>
// kernel: tpu_custom_call.1
= control target key start
LH: loop header
LB: loop body
LE: loop exit
PB: predicated region body
PF: predicated region fallthrough
CT: control target
= control target key end

     0   :  { %12 = vsyncpa [#allocation3], 0  ;;  %s769_s0 = inlined_call_operand.vmem [shape: f32[8,32], index: 0, kind: input, shape index: {}]   ;;  %s770_s1 = inlined_call_operand.hbm [shape: f32[32,128], index: 1, kind: input, shape index: {}]   ;;  %s771_s2 = inlined_call_operand.vmem [shape: f32[1,128], index: 2, kind: input, shape index: {}]   ;;  %s772_s3 = inlined_call_operand.vmem [shape: f32[128,128], index: 3, kind: input, shape index: {}]   ;;  %s773_s4 = inlined_call_operand.vmem [shape: f32[1,128], index: 4, kind: input, shape index: {}]   ;;  %s774_s5 = inlined_call_operand.vmem [shape: f32[128,8], index: 5, kind: input, shape index: {}]   ;;  %s775_s6 = inlined_call_operand.vmem [shape: f32[1,8], index: 6, kind: input, shape index: {}]   ;;  %s776_s7 = inlined_call_operand.hbm [shape: f32[8,8], index: 7, kind: output, shape index: {}]  }
   0x1   :  { %13 = vsyncpa [#allocation4], 0  ;;  %s569_s24 = smov [#allocation2]   ;;  %s521_s28 = scalar_lea.hbm %s770_s1, 512 }
   0x2   :  { %s21_s25 = sshll.u32 %s569_s24, 4  ;;  %p522_p0 = scmp.ne.s32.totalorder %s770_s1, %s521_s28  ;;  %s22_s25 = int_to_ptr.vmem [resolvable:$true] %s21_s25 }
   0x3   :  { %p525_p1 = scmp.lt.u32.totalorder %s521_s28, %s770_s1 }
   0x5   :  { %p527_p2 = pnand %p525_p1, %p522_p0 }
   0x7   :  { %530 = shalt.err (!%p527_p2)
}
   0x8   :  { %s531_s10 = scalar_lea.vmem %s22_s25, 512  ;;  %p536_p4 = scmp.lt.s32.totalorder %s22_s25, %s22_s25 }
   0x9   :  { %p532_p3 = scmp.ne.s32.totalorder %s22_s25, %s531_s10  ;;  %p537_p5 = scmp.lt.s32.totalorder %s531_s10, %s531_s10 }
   0xb   :  { %p538_p6 = por %p537_p5, %p536_p4 }
   0xd   :  { %p539_p7 = pnand %p538_p6, %p532_p3 }
   0xf   :  { %542 = shalt.err (!%p539_p7)
}
  0x10   :  { %s570_s11 = smov 128   ;;  %s571_s12 = smov 8  }
  0x11   :  { %27 = dma.hbm_to_vmem [thread:$0]  %s770_s1, 512, %s22_s25, [#allocation3], %s570_s11, %s570_s11, %s571_s12  }
  0x12   :  { %565 = dma.done.wait [#allocation3], 512  }
  0x13   :  { %566 = vsyncadd [#allocation3], 4294966784  ;;  %v572_v0 = vmov 0.0|0.0   ;;  %vm573_vm0 = vmmov 0   ;;  %v574_v1 = vmov 0.0   ;;  %v42_v2 = vld [vmem:[#allocation2] sm:$0xff] }
  0x14   :  { %460 = vmatprep.subr.bf16.mxu0 %v572_v0  ;;  %387 = vmatprep.mubr.msk.f32.mxu0 %vm573_vm0, %v574_v1  ;;  %v43_v3 = vld [vmem:[#allocation2 + $0x8] sm:$0xff]  ;;  %v44_v4 = vld [vmem:[#allocation2 + $0x10] sm:$0xff]  ;;  %v45_v6 = vld [vmem:[#allocation2 + $0x18] sm:$0xff]  ;;  %vm53_vm1 = vcmask 261120   ;;  %s575_s9 = smov [#allocation5]   ;;  %vm319_vm4 = vcmask 64512  }
  0x15   :  { %466 = vmatprep.subr.bf16.mxu1 %v572_v0  ;;  %422 = vmatprep.mubr.msk.f32.mxu1 %vm573_vm0, %v574_v1  ;;  %v461_v5 = vpack.c.bf16 %v43_v3, %v42_v2  ;;  %v130_v7 = vld [vmem:[%s772_s3] sm:$0xff]  ;;  %v131_v8 = vld [vmem:[%s772_s3 + $0x8] sm:$0xff]  ;;  %v132_v9 = vld [vmem:[%s772_s3 + $0x10] sm:$0xff]  ;;  %v464_v11 = vpack.c.bf16 %v45_v6, %v44_v4  ;;  %s327_s10 = sshll.u32 %s575_s9, 4  ;;  %s328_s10 = int_to_ptr.vmem [resolvable:$true] %s327_s10 }
  0x16   :  { %v133_v10 = vld [vmem:[%s772_s3 + $0x18] sm:$0xff]  ;;  %v467_v12 = vpack.c.bf16 %v131_v8, %v130_v7  ;;  %v134_v14 = vld [vmem:[%s772_s3 + $0x20] sm:$0xff]  ;;  %v135_v15 = vld [vmem:[%s772_s3 + $0x28] sm:$0xff]  ;;  %p548_p9 = scmp.lt.s32.totalorder %s328_s10, %s328_s10 }
  0x17   :  { %462 = vmatpush3.bf16.msra.mxu0 %v461_v5  ;;  %v470_v13 = vpack.c.bf16 %v133_v10, %v132_v9  ;;  %v41_v16 = vld [vmem:[%s769_s0] sm:$0xff]  ;;  %v473_v17 = vpack.c.bf16 %v135_v15, %v134_v14  ;;  %v136_v18 = vld [vmem:[%s772_s3 + $0x30] sm:$0xff]  ;;  %v137_v19 = vld [vmem:[%s772_s3 + $0x38] sm:$0xff] }
  0x18   :  { %463 = vmatprep.subr.bf16.mxu0 %v572_v0  ;;  %468 = vmatpush3.bf16.msra.mxu1 %v467_v12  ;;  %v476_v20 = vpack.c.bf16 %v137_v19, %v136_v18  ;;  %v138_v21 = vld [vmem:[%s772_s3 + $0x40] sm:$0xff]  ;;  %v139_v22 = vld [vmem:[%s772_s3 + $0x48] sm:$0xff]  ;;  %v140_v24 = vld [vmem:[%s772_s3 + $0x50] sm:$0xff] }
  0x19   :  { %469 = vmatprep.subr.bf16.mxu1 %v572_v0  ;;  %v479_v23 = vpack.c.bf16 %v139_v22, %v138_v21  ;;  %v141_v25 = vld [vmem:[%s772_s3 + $0x58] sm:$0xff]  ;;  %v142_v27 = vld [vmem:[%s772_s3 + $0x60] sm:$0xff]  ;;  %v143_v28 = vld [vmem:[%s772_s3 + $0x68] sm:$0xff] }
  0x1a   :  { %v482_v26 = vpack.c.bf16 %v141_v25, %v140_v24  ;;  %v485_v29 = vpack.c.bf16 %v143_v28, %v142_v27  ;;  %v144_v30 = vld [vmem:[%s772_s3 + $0x70] sm:$0xff]  ;;  %v145_v31 = vld [vmem:[%s772_s3 + $0x78] sm:$0xff]  ;;  %v226_v33 = vld [vmem:[%s774_s5] sm:$0xff] }
  0x1b   :  { %465 = vmatpush3.bf16.msra.mxu0 %v464_v11  ;;  %v488_v32 = vpack.c.bf16 %v145_v31, %v144_v30  ;;  %v227_v34 = vld [vmem:[%s774_s5 + $0x8] sm:$0xff]  ;;  %v228_v35 = vld [vmem:[%s774_s5 + $0x10] sm:$0xff]  ;;  %v229_v37 = vld [vmem:[%s774_s5 + $0x18] sm:$0xff] }
  0x1c   :  { %490 = vmatprep.subr.bf16.mxu0 %v572_v0  ;;  %471 = vmatpush3.bf16.msra.mxu1 %v470_v13  ;;  %v491_v36 = vpack.c.bf16 %v227_v34, %v226_v33  ;;  %v494_v38 = vpack.c.bf16 %v229_v37, %v228_v35  ;;  %v230_v39 = vld [vmem:[%s774_s5 + $0x20] sm:$0xff]  ;;  %v231_v40 = vld [vmem:[%s774_s5 + $0x28] sm:$0xff]  ;;  %v232_v42 = vld [vmem:[%s774_s5 + $0x30] sm:$0xff] }
  0x1d   :  { %472 = vmatprep.subr.bf16.mxu1 %v572_v0  ;;  %v497_v41 = vpack.c.bf16 %v231_v40, %v230_v39  ;;  %v233_v43 = vld [vmem:[%s774_s5 + $0x38] sm:$0xff]  ;;  %v234_v45 = vld [vmem:[%s774_s5 + $0x40] sm:$0xff]  ;;  %v235_v46 = vld [vmem:[%s774_s5 + $0x48] sm:$0xff] }
  0x1e   :  { %388 = vmatmul.mubr.msk.f32.vlgmr.msra.gmra.mrb[0].mxu0 %vm53_vm1, %v41_v16  ;;  %v500_v44 = vpack.c.bf16 %v233_v43, %v232_v42  ;;  %v503_v47 = vpack.c.bf16 %v235_v46, %v234_v45  ;;  %v236_v48 = vld [vmem:[%s774_s5 + $0x50] sm:$0xff]  ;;  %v237_v49 = vld [vmem:[%s774_s5 + $0x58] sm:$0xff]  ;;  %v238_v51 = vld [vmem:[%s774_s5 + $0x60] sm:$0xff] }
  0x1f   :  { %457 = vmatprep.mubr.msk.f32.mxu0 %vm573_vm0, %v574_v1  ;;  %492 = vmatpush3.bf16.msra.mxu0 %v491_v36  ;;  %v506_v50 = vpack.c.bf16 %v237_v49, %v236_v48  ;;  %v239_v52 = vld [vmem:[%s774_s5 + $0x68] sm:$0xff]  ;;  %v336_v54 = vld [vmem:[%s771_s2] ss:$0 sm:$0xff]  ;;  %v240_v60 = vld [vmem:[%s774_s5 + $0x70] sm:$0xff] }
  0x20   :  { %474 = vmatpush3.bf16.msra.mxu1 %v473_v17  ;;  %493 = vmatprep.subr.bf16.mxu0 %v572_v0  ;;  %v509_v53 = vpack.c.bf16 %v239_v52, %v238_v51  ;;  %v241_v61 = vld [vmem:[%s774_s5 + $0x78] sm:$0xff]  ;;  %v338_v63 = vld [vmem:[%s773_s4] ss:$0 sm:$0xff]  ;;  %s543_s4 = scalar_lea.vmem %s328_s10, 128 }
  0x21   :  { %475 = vmatprep.subr.bf16.mxu1 %v572_v0  ;;  %v512_v62 = vpack.c.bf16 %v241_v61, %v240_v60  ;;  %v339_v5 = vld [vmem:[%s775_s6] ss:$0 sm:$0xff]  ;;  %p544_p8 = scmp.ne.s32.totalorder %s328_s10, %s543_s4  ;;  %p549_p10 = scmp.lt.s32.totalorder %s543_s4, %s543_s4 }
  0x23   :  { %495 = vmatpush3.bf16.msra.mxu0 %v494_v38  ;;  %p550_p11 = por %p549_p10, %p548_p9 }
  0x24   :  { %477 = vmatpush3.bf16.msra.mxu1 %v476_v20  ;;  %496 = vmatprep.subr.bf16.mxu0 %v572_v0 }
  0x25   :  { %478 = vmatprep.subr.bf16.mxu1 %v572_v0  ;;  %p551_p12 = pnand %p550_p11, %p544_p8 }
  0x27   :  { %498 = vmatpush3.bf16.msra.mxu0 %v497_v41 }
  0x28   :  { %480 = vmatpush3.bf16.msra.mxu1 %v479_v23  ;;  %499 = vmatprep.subr.bf16.mxu0 %v572_v0 }
  0x29   :  { %481 = vmatprep.subr.bf16.mxu1 %v572_v0 }
  0x2b   :  { %501 = vmatpush3.bf16.msra.mxu0 %v500_v44 }
  0x2c   :  { %483 = vmatpush3.bf16.msra.mxu1 %v482_v26  ;;  %502 = vmatprep.subr.bf16.mxu0 %v572_v0 }
  0x2d   :  { %484 = vmatprep.subr.bf16.mxu1 %v572_v0 }
  0x2f   :  { %504 = vmatpush3.bf16.msra.mxu0 %v503_v47 }
  0x30   :  { %486 = vmatpush3.bf16.msra.mxu1 %v485_v29  ;;  %505 = vmatprep.subr.bf16.mxu0 %v572_v0 }
  0x31   :  { %487 = vmatprep.subr.bf16.mxu1 %v572_v0 }
  0x33   :  { %507 = vmatpush3.bf16.msra.mxu0 %v506_v50 }
  0x34   :  { %489 = vmatpush3.bf16.msra.mxu1 %v488_v32  ;;  %508 = vmatprep.subr.bf16.mxu0 %v572_v0 }
  0x37   :  { %510 = vmatpush3.bf16.msra.mxu0 %v509_v53 }
  0x38   :  { %511 = vmatprep.subr.bf16.mxu0 %v572_v0 }
  0x3b   :  { %513 = vmatpush3.bf16.msra.mxu0 %v512_v62 }
  0xf1   :  { %v123_v55 = vpop.f32.mrb[0].mxu0 }
  0xf2   :  { %v124_v56 = vadd.f32 %v336_v54, %v123_v55  ;;  %v389_v57 = vpop.f32.mrb[1].mxu0 }
  0xf4   :  { %v128_v58 = vmul.f32 0.01, %v124_v56  ;;  %vm127_vm2 = vcmp.gt.f32.partialorder %v124_v56, 0.0 }
  0xf6   :  { %v129_v59 = vsel %vm127_vm2, %v124_v56, %v128_v58 }
  0xf7   :  { %423 = vmatmul.mubr.f32.vlgmr.msra.gmra.mrb[0].mxu1 %v129_v59 }
 0x1ca   :  { %v219_v0 = vpop.f32.mrb[0].mxu1 }
 0x1cb   :  { %v220_v1 = vadd.f32 %v338_v63, %v219_v0  ;;  %v424_v2 = vpop.f32.mrb[1].mxu1 }
 0x1cd   :  { %vm223_vm3 = vcmp.gt.f32.partialorder %v220_v1, 0.0  ;;  %v224_v3 = vmul.f32 0.01, %v220_v1 }
 0x1cf   :  { %v225_v4 = vsel %vm223_vm3, %v220_v1, %v224_v3 }
 0x1d0   :  { %458 = vmatmul.mubr.f32.vlgmr.msra.gmra.mrb[2].mxu0 %v225_v4 }
 0x2a3   :  { %v315_v6 = vpop.f32.mrb[2].mxu0 }
 0x2a4   :  { %v316_v7 = vadd.f32 %v339_v5, %v315_v6  ;;  %v459_v8 = vpop.f32.mrb[3].mxu0 }
 0x2a6   :  { %320 = vst.msk [vmem:[#allocation5] sm:$0xff] %vm319_vm4, %v316_v7 }
 0x2a7   :  { %554 = shalt.err (!%p551_p12)
}
 0x2a8   :  { %s555_s12 = scalar_lea.hbm %s776_s7, 128 }
 0x2a9   :  { %p556_p13 = scmp.ne.s32.totalorder %s776_s7, %s555_s12  ;;  %p559_p0 = scmp.lt.u32.totalorder %s555_s12, %s776_s7 }
 0x2ab   :  { %p561_p1 = pnand %p559_p0, %p556_p13 }
 0x2ad   :  { %564 = shalt.err (!%p561_p1)
}
 0x2ae   :  { %330 = dma.vmem_to_hbm [thread:$0]  %s328_s10, 128, %s776_s7, [#allocation4]  }
 0x2af   :  { %567 = dma.done.wait [#allocation4], 128  }
 0x2b0   :  { %568 = vsyncadd [#allocation4], 4294967168 }
 0x2b1   :  { %334 = vsyncpa [#allocation3], 1 }
 0x2b2   :  { %335 = vsyncpa [#allocation4], 1 }

</bundles_post_ra>
